<compile_context>
chip_gen: v7x
topology: tpu7x:2x2x1
jax: 0.10.0
libtpu: 0.0.40
codegen_flags: <defaults>
</compile_context>

<pallas_src>
import functools

import jax
import jax.numpy as jnp
from jax.experimental import pallas as pl
from jax.experimental.pallas import tpu as pltpu

_VMEM = pl.BlockSpec(memory_space=pltpu.MemorySpace.VMEM)

_HORI_SET = [(i, i + 1) for i in range(9) if i % 3 != 2]
_VERT_SET = [(i, i + 3) for i in range(6)]
_PAIR_ORDER = [idx for pair in (_HORI_SET + _VERT_SET) for idx in pair]  # 24 fragment ids


def _round_up(x, m):
    return (x + m - 1) // m * m


# ----------------------------- fused Pallas kernel ---------------------------------

def _actor_fused_kernel(
    fp_ref,         # (Bp, 27)    f32   pooled RGB means of the 9 fragments, feature = frag*3 + ch
    op_ref,         # (Bp, 3)     f32   outsider pooled RGB means
    w_img_ref,      # (27, 256)   bf16  stem∘classifier∘(pair-gathered fc1), composed offline
    bn_ref,         # (2, 256)    f32   row0 = BN scale, row1 = BN shift (all image-branch biases folded)
    w_fc2act_ref,   # (256, 128)  bf16  fen fc2 ∘ actor fc1 (image half), composed offline
    w_out_ref,      # (3, 128)    bf16  outsider stem∘classifier∘actor fc1 (outsider half), composed
    act_b_ref,      # (2, 128)    f32   row0 = effective actor fc1 bias, row1 = padded actor fc2 bias
    act_fc2_w_ref,  # (128, 128)  bf16  actor fc2 weight, columns >= action_num are zero
    o_ref,          # (Bp, 128)   f32   lane-dense softmax output
):
    f32 = jnp.float32
    bf16 = jnp.bfloat16

    # ---- image branch (everything up to BatchNorm is one composed matmul) ----
    h1 = jnp.dot(fp_ref[...].astype(bf16), w_img_ref[...], preferred_element_type=f32)
    # dropout = identity (eval); BatchNorm1d folded to a single scale/shift; ReLU
    h1 = jnp.maximum(h1 * bn_ref[0:1, :] + bn_ref[1:2, :], 0.0)

    # ---- actor fc1: image half (fen fc2 folded in) + outsider half (whole branch folded in) ----
    h = (
        jnp.dot(h1.astype(bf16), w_fc2act_ref[...], preferred_element_type=f32)
        + jnp.dot(op_ref[...].astype(bf16), w_out_ref[...], preferred_element_type=f32)
        + act_b_ref[0:1, :]
    )
    h = jnp.maximum(h, 0.0)                              # dropout = identity (eval)

    # ---- actor fc2 + softmax (padded columns biased to -1e30 -> prob 0) ----
    logits = (
        jnp.dot(h.astype(bf16), act_fc2_w_ref[...], preferred_element_type=f32)
        + act_b_ref[1:2, :]
    )
    m = jnp.max(logits, axis=-1, keepdims=True)
    e = jnp.exp(logits - m)
    o_ref[...] = e / jnp.sum(e, axis=-1, keepdims=True)  # exact division: rows sum to 1


# --------------------------- parameters (PyTorch layout) --------------------------------

def init_params(key, action_num):
    ks = iter(jax.random.split(key, 32))

    def rnd(shape, scale=0.05):
        return scale * jax.random.normal(next(ks), shape, dtype=jnp.float32)

    return {
        # EfficientNet-B0 backbone stand-ins (global-average-pool + 3->1280 projection)
        "ef_img_stem_w": rnd((3, 1280)), "ef_img_stem_b": rnd((1280,)),
        "ef_out_stem_w": rnd((3, 1280)), "ef_out_stem_b": rnd((1280,)),
        # replaced classifiers
        "ef_img_cls_w": rnd((1280, 64)), "ef_img_cls_b": rnd((64,)),
        "ef_out_cls_w": rnd((1280, 128)), "ef_out_cls_b": rnd((128,)),
        # fen_model MLP (hidden_size1 = hidden_size2 = 256)
        "fen_fc1_w": rnd((128 * 12, 256)), "fen_fc1_b": rnd((256,)),
        "fen_bn_gamma": 1.0 + rnd((256,)), "fen_bn_beta": rnd((256,)),
        "fen_bn_mean": jnp.zeros((256,), jnp.float32),
        "fen_bn_var": jnp.ones((256,), jnp.float32),
        "fen_fc2_w": rnd((256, 256)), "fen_fc2_b": rnd((256,)),
        # actor head
        "act_fc1_w": rnd((384, 128)), "act_fc1_b": rnd((128,)),
        "act_fc2_w": rnd((128, action_num)), "act_fc2_b": rnd((action_num,)),
    }


def prepare_params(params, action_num, eps=1e-5):
    """One-time offline transform: fold every bias-less-nonlinearity affine chain into one matrix."""
    f32, bf16 = jnp.float32, jnp.bfloat16
    hidden = params["fen_fc1_w"].shape[1]                                       # 256

    # 1) Fold the hori/vert pair gather into fc1:
    #    W1_eff[f] = sum of the fc1 64-row blocks whose input slot is fragment f.
    w1_blocks = params["fen_fc1_w"].reshape(len(_PAIR_ORDER), 64, hidden)       # (24, 64, H)
    onehot = (jnp.asarray(_PAIR_ORDER)[:, None] == jnp.arange(9)[None, :]).astype(f32)
    w1_eff = jnp.einsum("kf,kdh->fdh", onehot, w1_blocks)                       # (9, 64, H)

    # 2) Compose image affine chain: pooled RGB -> stem -> classifier -> gathered fc1.
    stem_cls = params["ef_img_stem_w"] @ params["ef_img_cls_w"]                 # (3, 64)
    w_img = jnp.einsum("cd,fdh->fch", stem_cls, w1_eff).reshape(27, hidden)     # (27, H), row = f*3+c
    cls_bias_feat = params["ef_img_stem_b"] @ params["ef_img_cls_w"] + params["ef_img_cls_b"]
    b_img = cls_bias_feat @ w1_eff.sum(axis=0) + params["fen_fc1_b"]            # (H,)

    # 3) Fold all image-branch biases + BatchNorm1d (running stats) into one scale/shift.
    scale = params["fen_bn_gamma"] * jax.lax.rsqrt(params["fen_bn_var"] + eps)
    shift = (b_img - params["fen_bn_mean"]) * scale + params["fen_bn_beta"]
    bn_pack = jnp.stack([scale, shift], axis=0)                                 # (2, H)

    # 4) fen fc2 ∘ actor fc1 (image half) and outsider stem ∘ classifier ∘ actor fc1 (outsider half).
    act_w1_img = params["act_fc1_w"][:hidden]                                   # (256, 128)
    act_w1_out = params["act_fc1_w"][hidden:]                                   # (128, 128)
    w_fc2act = params["fen_fc2_w"] @ act_w1_img                                 # (256, 128)
    b_from_img = params["fen_fc2_b"] @ act_w1_img                               # (128,)

    w_out = (params["ef_out_stem_w"] @ params["ef_out_cls_w"]) @ act_w1_out     # (3, 128)
    out_bias = params["ef_out_stem_b"] @ params["ef_out_cls_w"] + params["ef_out_cls_b"]
    b_from_out = out_bias @ act_w1_out                                          # (128,)

    act_fc1_b_eff = params["act_fc1_b"] + b_from_img + b_from_out               # (128,)

    # 5) Actor fc2 padded to a lane-dense 128-wide output; padded columns get -1e30 bias.
    a = action_num
    act_fc2_w = jnp.zeros((128, 128), f32).at[:, :a].set(params["act_fc2_w"])
    act_fc2_b = jnp.full((128,), -1e30, f32).at[:a].set(params["act_fc2_b"])
    act_b_pack = jnp.stack([act_fc1_b_eff, act_fc2_b], axis=0)                  # (2, 128)

    return {
        "w_img": w_img.astype(bf16),
        "bn_pack": bn_pack.astype(f32),
        "w_fc2act": w_fc2act.astype(bf16),
        "w_out": w_out.astype(bf16),
        "act_b_pack": act_b_pack.astype(f32),
        "act_fc2_w": act_fc2_w.astype(bf16),
    }


# --------------------------------- forward ----------------------------------------------

@functools.partial(jax.jit, static_argnames=("action_num",))
def actor_forward(kp, image, outsider_piece, *, action_num):
    B = image.shape[0]
    Bp = _round_up(B, 8)                                     # sublane-aligned row count

    # Fragment pooling straight from the NCHW image (no materialized fragment stack):
    # (B,3,288,288) -> (B,C,3,96,3,96) -> mean over each 96x96 block -> (B,C,3,3) -> (B,27),
    # feature index = (row*3 + col)*3 + channel  == fragment*3 + channel.
    fp = image.reshape(B, 3, 3, 96, 3, 96).mean(axis=(3, 5))
    fp = fp.transpose(0, 2, 3, 1).reshape(B, 27)
    fp = jnp.pad(fp, ((0, Bp - B), (0, 0)))

    op = outsider_piece.mean(axis=(-1, -2))                  # (B, 3)
    op = jnp.pad(op, ((0, Bp - B), (0, 0)))

    flops = 2 * Bp * (27 * 256 + 256 * 128 + 3 * 128 + 128 * 128)
    bytes_accessed = (
        Bp * 27 * 4 + Bp * 3 * 4                             # activations in
        + (27 * 256 + 256 * 128 + 3 * 128 + 128 * 128) * 2   # bf16 weights
        + (2 * 256 + 2 * 128) * 4                            # packed scale/shift + biases
        + Bp * 128 * 4                                       # output
    )

    probs_pad = pl.pallas_call(
        _actor_fused_kernel,
        out_shape=jax.ShapeDtypeStruct((Bp, 128), jnp.float32),
        in_specs=[_VMEM] * 8,
        out_specs=_VMEM,
        cost_estimate=pl.CostEstimate(
            flops=flops, transcendentals=Bp * 128, bytes_accessed=bytes_accessed),
        # NOTE: for large inference batches, add a batch grid (tiles of >=128 rows) with
        # dimension_semantics=("parallel",) so both v7x TensorCores get work; at B=2 a
        # single whole-array call is optimal and the ~115 KB of weights trivially fit VMEM.
    )(
        fp, op,
        kp["w_img"], kp["bn_pack"], kp["w_fc2act"], kp["w_out"],
        kp["act_b_pack"], kp["act_fc2_w"],
    )
    return probs_pad[:B, :action_num]


# ----------------------------------- main ------------------------------------------------

if __name__ == "__main__":
    action_num = 8
    B = 2

    key = jax.random.PRNGKey(0)
    k_param, k_img, k_out = jax.random.split(key, 3)

    params = init_params(k_param, action_num)
    kp = prepare_params(params, action_num)

    image = jax.random.normal(k_img, (B, 3, 288, 288), dtype=jnp.float32)
    outsider_piece = jax.random.normal(k_out, (B, 3, 96, 96), dtype=jnp.float32)

    probs = actor_forward(kp, image, outsider_piece, action_num=action_num)
    probs = jax.block_until_ready(probs)

    assert probs.shape == (B, action_num)
    # exact-division softmax: rows sum to 1 within f32 rounding
    assert bool(jnp.all(jnp.abs(jnp.sum(probs, axis=1) - 1.0) < 1e-3))
    assert bool(jnp.all(probs >= 0.0))
    print("KERNEL_OK")
</pallas_src>

<mosaic_0001>
module attributes {stable_mosaic.version = 11 : i64} {
  func.func @_actor_fused_kernel(%arg0: memref<8x27xf32, #tpu.memory_space<vmem>>, %arg1: memref<8x3xf32, #tpu.memory_space<vmem>>, %arg2: memref<27x256xbf16, #tpu.memory_space<vmem>>, %arg3: memref<2x256xf32, #tpu.memory_space<vmem>>, %arg4: memref<256x128xbf16, #tpu.memory_space<vmem>>, %arg5: memref<3x128xbf16, #tpu.memory_space<vmem>>, %arg6: memref<2x128xf32, #tpu.memory_space<vmem>>, %arg7: memref<128x128xbf16, #tpu.memory_space<vmem>>, %arg8: memref<8x128xf32, #tpu.memory_space<vmem>>) attributes {dimension_semantics = [], scalar_prefetch = 0 : i64, scratch_operands = 0 : i64, tpu.core_type = #tpu.core_type<tc>} {
    %c0 = arith.constant 0 : index
    %c0_0 = arith.constant 0 : index
    %0 = vector.load %arg0[%c0, %c0_0] : memref<8x27xf32, #tpu.memory_space<vmem>>, vector<8x27xf32>
    %1 = arith.truncf %0 : vector<8x27xf32> to vector<8x27xbf16>
    %c0_1 = arith.constant 0 : index
    %c0_2 = arith.constant 0 : index
    %2 = vector.load %arg2[%c0_1, %c0_2] : memref<27x256xbf16, #tpu.memory_space<vmem>>, vector<27x256xbf16>
    %cst = arith.constant dense<0.000000e+00> : vector<8x256xf32>
    %3 = tpu.matmul %1, %2, %cst {dimension_numbers = #tpu.dot_dimension_numbers<[1], [0], [0], [1], [0, 0, 1, 1], [], []>} : vector<8x27xbf16>, vector<27x256xbf16>, vector<8x256xf32> -> vector<8x256xf32>
    %c0_3 = arith.constant 0 : index
    %c0_4 = arith.constant 0 : index
    %4 = vector.load %arg3[%c0_3, %c0_4] : memref<2x256xf32, #tpu.memory_space<vmem>>, vector<1x256xf32>
    %5 = vector.broadcast %4 : vector<1x256xf32> to vector<8x256xf32>
    %6 = arith.mulf %3, %5 : vector<8x256xf32>
    %c1 = arith.constant 1 : index
    %c0_5 = arith.constant 0 : index
    %7 = vector.load %arg3[%c1, %c0_5] : memref<2x256xf32, #tpu.memory_space<vmem>>, vector<1x256xf32>
    %8 = vector.broadcast %7 : vector<1x256xf32> to vector<8x256xf32>
    %9 = arith.addf %6, %8 : vector<8x256xf32>
    %cst_6 = arith.constant 0.000000e+00 : f32
    %10 = vector.broadcast %cst_6 : f32 to vector<8x256xf32>
    %11 = arith.maximumf %9, %10 : vector<8x256xf32>
    %12 = arith.truncf %11 : vector<8x256xf32> to vector<8x256xbf16>
    %c0_7 = arith.constant 0 : index
    %c0_8 = arith.constant 0 : index
    %13 = vector.load %arg4[%c0_7, %c0_8] : memref<256x128xbf16, #tpu.memory_space<vmem>>, vector<256x128xbf16>
    %cst_9 = arith.constant dense<0.000000e+00> : vector<8x128xf32>
    %14 = tpu.matmul %12, %13, %cst_9 {dimension_numbers = #tpu.dot_dimension_numbers<[1], [0], [0], [1], [0, 0, 1, 1], [], []>} : vector<8x256xbf16>, vector<256x128xbf16>, vector<8x128xf32> -> vector<8x128xf32>
    %c0_10 = arith.constant 0 : index
    %c0_11 = arith.constant 0 : index
    %15 = vector.load %arg1[%c0_10, %c0_11] : memref<8x3xf32, #tpu.memory_space<vmem>>, vector<8x3xf32>
    %16 = arith.truncf %15 : vector<8x3xf32> to vector<8x3xbf16>
    %c0_12 = arith.constant 0 : index
    %c0_13 = arith.constant 0 : index
    %17 = vector.load %arg5[%c0_12, %c0_13] : memref<3x128xbf16, #tpu.memory_space<vmem>>, vector<3x128xbf16>
    %cst_14 = arith.constant dense<0.000000e+00> : vector<8x128xf32>
    %18 = tpu.matmul %16, %17, %cst_14 {dimension_numbers = #tpu.dot_dimension_numbers<[1], [0], [0], [1], [0, 0, 1, 1], [], []>} : vector<8x3xbf16>, vector<3x128xbf16>, vector<8x128xf32> -> vector<8x128xf32>
    %19 = arith.addf %14, %18 : vector<8x128xf32>
    %c0_15 = arith.constant 0 : index
    %c0_16 = arith.constant 0 : index
    %20 = vector.load %arg6[%c0_15, %c0_16] : memref<2x128xf32, #tpu.memory_space<vmem>>, vector<1x128xf32>
    %21 = vector.broadcast %20 : vector<1x128xf32> to vector<8x128xf32>
    %22 = arith.addf %19, %21 : vector<8x128xf32>
    %cst_17 = arith.constant 0.000000e+00 : f32
    %23 = vector.broadcast %cst_17 : f32 to vector<8x128xf32>
    %24 = arith.maximumf %22, %23 : vector<8x128xf32>
    %25 = arith.truncf %24 : vector<8x128xf32> to vector<8x128xbf16>
    %c0_18 = arith.constant 0 : index
    %c0_19 = arith.constant 0 : index
    %26 = vector.load %arg7[%c0_18, %c0_19] : memref<128x128xbf16, #tpu.memory_space<vmem>>, vector<128x128xbf16>
    %cst_20 = arith.constant dense<0.000000e+00> : vector<8x128xf32>
    %27 = tpu.matmul %25, %26, %cst_20 {dimension_numbers = #tpu.dot_dimension_numbers<[1], [0], [0], [1], [0, 0, 1, 1], [], []>} : vector<8x128xbf16>, vector<128x128xbf16>, vector<8x128xf32> -> vector<8x128xf32>
    %c1_21 = arith.constant 1 : index
    %c0_22 = arith.constant 0 : index
    %28 = vector.load %arg6[%c1_21, %c0_22] : memref<2x128xf32, #tpu.memory_space<vmem>>, vector<1x128xf32>
    %29 = vector.broadcast %28 : vector<1x128xf32> to vector<8x128xf32>
    %30 = arith.addf %27, %29 : vector<8x128xf32>
    %cst_23 = arith.constant dense<0xFF800000> : vector<8xf32>
    %31 = vector.multi_reduction <maximumf>, %30, %cst_23 [1] : vector<8x128xf32> to vector<8xf32>
    %32 = vector.shape_cast %31 : vector<8xf32> to vector<8x1xf32>
    %33 = vector.broadcast %32 : vector<8x1xf32> to vector<8x128xf32>
    %34 = arith.subf %30, %33 : vector<8x128xf32>
    %35 = math.exp %34 : vector<8x128xf32>
    %cst_24 = arith.constant dense<0.000000e+00> : vector<8xf32>
    %36 = vector.multi_reduction <add>, %35, %cst_24 [1] : vector<8x128xf32> to vector<8xf32>
    %37 = vector.shape_cast %36 : vector<8xf32> to vector<8x1xf32>
    %38 = vector.broadcast %37 : vector<8x1xf32> to vector<8x128xf32>
    %39 = arith.divf %35, %38 : vector<8x128xf32>
    %c0_25 = arith.constant 0 : index
    %c0_26 = arith.constant 0 : index
    %40 = vector.load %arg8[%c0_25, %c0_26] : memref<8x128xf32, #tpu.memory_space<vmem>>, vector<8x128xf32>
    tpu.vector_store %arg8[%c0_25, %c0_26], %39 {strides = array<i32>} : memref<8x128xf32, #tpu.memory_space<vmem>>, vector<8x128xf32>,
    return
  }
}

</mosaic_0001>

<bundles_post_ra>
// kernel: actor_forward.1
= control target key start
LH: loop header
LB: loop body
LE: loop exit
PB: predicated region body
PF: predicated region fallthrough
CT: control target
= control target key end

     0   :  { %vm58_vm0 = vcmask 1044480   ;;  %vm59_vm1 = vcmask 1045504   ;;  %v625_v1 = vmov 65535   ;;  %v626_v3 = vmov 0   ;;  %s793_s2 = inlined_call_operand.vmem [shape: bf16[27,256], index: 2, kind: input, shape index: {}]   ;;  %s794_s0 = inlined_call_operand.vmem [shape: f32[8,27], index: 0, kind: input, shape index: {}]   ;;  %s795_s5 = inlined_call_operand.vmem [shape: bf16[3,128], index: 5, kind: input, shape index: {}]   ;;  %s796_s1 = inlined_call_operand.vmem [shape: f32[8,3], index: 1, kind: input, shape index: {}]   ;;  %s797_s4 = inlined_call_operand.vmem [shape: bf16[256,128], index: 4, kind: input, shape index: {}]   ;;  %s798_s7 = inlined_call_operand.vmem [shape: bf16[128,128], index: 7, kind: input, shape index: {}]   ;;  %s799_s3 = inlined_call_operand.vmem [shape: f32[2,256], index: 3, kind: input, shape index: {}]   ;;  %s800_s6 = inlined_call_operand.vmem [shape: f32[2,128], index: 6, kind: input, shape index: {}]   ;;  %s801_s8 = inlined_call_operand.vmem [shape: f32[8,128], index: 8, kind: output, shape index: {}]  }
   0x1   :  { %v591_v0 = vld [vmem:[%s793_s2 + $0x4] ss:$8 sps:$4 sm:$0xff]   ;;  %v60_v2 = vsel %vm58_vm0, 4294967295, %v625_v1  ;;  %100 = vmatprep.mubr.bf16.mxu0 %v626_v3  ;;  %v593_v4 = vld [vmem:[%s793_s2] ss:$8 sps:$4 sm:$0xff]   ;;  %vm181_vm2 = vcmask 1040384   ;;  %v111_v40 = vlaneseq }
   0x2   :  { %v61_v5 = vsel %vm59_vm1, %v60_v2, 0  ;;  %68 = vmatprep.subr.bf16.mxu0 %v591_v0  ;;  %v594_v6 = vld [vmem:[%s793_s2 + $0x14] ss:$8 sps:$4 sm:$0x3f]   ;;  %v30_v8 = vld [vmem:[%s794_s0] sm:$0xff]  ;;  %vm182_vm3 = vcmask 1041408  }
   0x3   :  { %v596_v7 = vld [vmem:[%s793_s2 + $0x10] ss:$8 sps:$4 sm:$0x3f]   ;;  %69 = vmatpush1.bf16.msra.mxu0 %v593_v4  ;;  %v176_v9 = vld [vmem:[%s795_s5] sm:$0x3]  ;;  %v66_v10 = vand.u32 %v594_v6, %v61_v5  ;;  %v627_v12 = vmov 0.0   ;;  %v31_v17 = vpack.c.bf16 %v30_v8, %v30_v8 }
   0x4   :  { %v63_v11 = vand.u32 %v596_v7, %v61_v5  ;;  %561 = vmatprep.subr.bf16.mxu1 %v627_v12  ;;  %v183_v13 = vsel %vm181_vm2, 4294967295, %v625_v1  ;;  %v174_v14 = vld [vmem:[%s796_s1] sm:$0xff]  ;;  %vm628_vm4 = vmmov 0   ;;  %vm54_vm5 = vcmask 220160   ;;  %v599_v21 = vld [vmem:[%s797_s4 + $0x48] sm:$0xff]   ;;  %v601_v23 = vld [vmem:[%s797_s4 + $0x50] sm:$0xff]  }
   0x5   :  { %v184_v15 = vsel %vm182_vm3, %v183_v13, 0  ;;  %v597_v16 = vld [vmem:[%s797_s4 + $0x40] sm:$0xff]   ;;  %70 = vmatprep.subr.bf16.mxu0 %v66_v10  ;;  %563 = vmatprep.mubr.msk.bf16.mxu1 %vm628_vm4, %v627_v12  ;;  %v175_v19 = vpack.c.bf16 %v174_v14, %v174_v14  ;;  %vm177_vm6 = vcmask 23552   ;;  %v600_v22 = vld [vmem:[%s797_s4 + $0x8] sm:$0xff]   ;;  %v602_v24 = vld [vmem:[%s797_s4 + $0x10] sm:$0xff]   ;;  %v112_v41 = vshrl.u32 %v111_v40, 7 }
   0x6   :  { %v186_v18 = vand.u32 %v184_v15, %v176_v9  ;;  %v598_v20 = vld [vmem:[%s797_s4] sm:$0xff]   ;;  %v603_v25 = vld [vmem:[%s797_s4 + $0x58] sm:$0xff]   ;;  %v607_v29 = vld [vmem:[%s797_s4 + $0x68] sm:$0xff]  }
   0x7   :  { %71 = vmatpush1.bf16.msra.mxu0 %v63_v11  ;;  %v604_v26 = vld [vmem:[%s797_s4 + $0x18] sm:$0xff]   ;;  %v605_v27 = vld [vmem:[%s797_s4 + $0x60] sm:$0xff]   ;;  %v608_v30 = vld [vmem:[%s797_s4 + $0x28] sm:$0xff]   ;;  %v113_v42 = vsub.s32 0, %v112_v41  ;;  %v117_v44 = vsub.s32 1, %v112_v41 }
   0x8   :  { %562 = vmatpush3.bf16.msra.mxu1 %v186_v18  ;;  %567 = vmatprep.subr.bf16.mxu0 %v627_v12  ;;  %v606_v28 = vld [vmem:[%s797_s4 + $0x20] sm:$0xff]   ;;  %v609_v31 = vld [vmem:[%s797_s4 + $0x70] sm:$0xff]   ;;  %v611_v33 = vld [vmem:[%s797_s4 + $0x78] sm:$0xff]  }
   0x9   :  { %530 = vmatprep.subr.bf16.mxu1 %v597_v16  ;;  %v610_v32 = vld [vmem:[%s797_s4 + $0x30] sm:$0xff]   ;;  %v612_v34 = vld [vmem:[%s797_s4 + $0x38] sm:$0xff]   ;;  %v613_v35 = vld [vmem:[%s798_s7] sm:$0xff]  }
   0xa   :  { %499 = vmatmul.mubr.msk.bf16.vlgmr.msra.gmra.mrb[0].mxu0 %vm54_vm5, %v31_v17  ;;  %v614_v36 = vld [vmem:[%s798_s7 + $0x8] sm:$0xff]   ;;  %v615_v37 = vld [vmem:[%s798_s7 + $0x10] sm:$0xff]   ;;  %v616_v38 = vld [vmem:[%s798_s7 + $0x18] sm:$0xff]  }
   0xb   :  { %564 = vmatmul.mubr.msk.bf16.vlgmr.msra.gmra.mrb[0].mxu1 %vm177_vm6, %v175_v19  ;;  %583 = vmatprep.mubr.msk.bf16.mxu0 %vm628_vm4, %v627_v12  ;;  %v617_v39 = vld [vmem:[%s798_s7 + $0x20] sm:$0xff]   ;;  %v618_v2 = vld [vmem:[%s798_s7 + $0x28] sm:$0xff]   ;;  %v619_v3 = vld [vmem:[%s798_s7 + $0x30] sm:$0xff]  }
   0xc   :  { %531 = vmatpush3.bf16.msra.mxu1 %v598_v20  ;;  %568 = vmatpush3.bf16.msra.mxu0 %v613_v35  ;;  %v109_v43 = vld [vmem:[%s799_s3] ss:$2 sm:$0x3]  ;;  %v500_v45 = vld [vmem:[%s799_s3 + $0x1] ss:$2 sm:$0x3] }
   0xd   :  { %532 = vmatprep.subr.bf16.mxu1 %v599_v21  ;;  %569 = vmatprep.subr.bf16.mxu0 %v627_v12  ;;  %v114_v46 = vrot.slane %v109_v43, %v113_v42  ;;  %v118_v47 = vrot.slane %v109_v43, %v117_v44  ;;  %v129_v48 = vrot.slane %v500_v45, %v113_v42  ;;  %v620_v4 = vld [vmem:[%s798_s7 + $0x38] sm:$0xff]   ;;  %v518_v9 = vld [vmem:[%s800_s6] ss:$0 sm:$0xff] }
   0xe   :  { %v133_v50 = vrot.slane %v500_v45, %v117_v44 }
  0x10   :  { %533 = vmatpush3.bf16.msra.mxu1 %v600_v22  ;;  %570 = vmatpush3.bf16.msra.mxu0 %v614_v36 }
  0x11   :  { %534 = vmatprep.subr.bf16.mxu1 %v601_v23  ;;  %571 = vmatprep.subr.bf16.mxu0 %v627_v12 }
  0x14   :  { %535 = vmatpush3.bf16.msra.mxu1 %v602_v24  ;;  %572 = vmatpush3.bf16.msra.mxu0 %v615_v37 }
  0x15   :  { %536 = vmatprep.subr.bf16.mxu1 %v603_v25  ;;  %573 = vmatprep.subr.bf16.mxu0 %v627_v12 }
  0x18   :  { %537 = vmatpush3.bf16.msra.mxu1 %v604_v26  ;;  %574 = vmatpush3.bf16.msra.mxu0 %v616_v38 }
  0x19   :  { %538 = vmatprep.subr.bf16.mxu1 %v605_v27  ;;  %575 = vmatprep.subr.bf16.mxu0 %v627_v12 }
  0x1c   :  { %539 = vmatpush3.bf16.msra.mxu1 %v606_v28  ;;  %576 = vmatpush3.bf16.msra.mxu0 %v617_v39 }
  0x1d   :  { %540 = vmatprep.subr.bf16.mxu1 %v607_v29  ;;  %577 = vmatprep.subr.bf16.mxu0 %v627_v12 }
  0x20   :  { %541 = vmatpush3.bf16.msra.mxu1 %v608_v30  ;;  %578 = vmatpush3.bf16.msra.mxu0 %v618_v2 }
  0x21   :  { %542 = vmatprep.subr.bf16.mxu1 %v609_v31  ;;  %579 = vmatprep.subr.bf16.mxu0 %v627_v12 }
  0x24   :  { %543 = vmatpush3.bf16.msra.mxu1 %v610_v32  ;;  %580 = vmatpush3.bf16.msra.mxu0 %v619_v3 }
  0x25   :  { %544 = vmatprep.subr.bf16.mxu1 %v611_v33  ;;  %581 = vmatprep.subr.bf16.mxu0 %v627_v12  ;;  %v519_v12 = vld [vmem:[%s800_s6 + $0x1] ss:$0 sm:$0xff] }
  0x28   :  { %545 = vmatpush3.bf16.msra.mxu1 %v612_v34  ;;  %582 = vmatpush3.bf16.msra.mxu0 %v620_v4 }
  0xdd   :  { %v102_v49 = vpop.f32.mrb[0].mxu0 }
  0xde   :  { %v121_v51 = vmul.f32 %v114_v46, %v102_v49  ;;  %v104_v52 = vpop.f32.mrb[1].mxu0  ;;  %v222_v53 = vpop.f32.mrb[0].mxu1 }
  0xdf   :  { %v122_v54 = vmul.f32 %v118_v47, %v104_v52  ;;  %v106_v55 = vpop.f32.mrb[2].mxu0  ;;  %v565_v56 = vpop.f32.mrb[1].mxu1 }
  0xe0   :  { %v136_v57 = vadd.f32 %v129_v48, %v121_v51  ;;  %v107_v58 = vpop.f32.mrb[3].mxu0  ;;  %v225_v59 = vpop.f32.mrb[2].mxu1 }
  0xe1   :  { %v137_v60 = vadd.f32 %v133_v50, %v122_v54  ;;  %v566_v61 = vpop.f32.mrb[3].mxu1 }
  0xe2   :  { %v138_v62 = vmax.f32 %v136_v57, 0.0 }
  0xe3   :  { %v139_v63 = vmax.f32 %v137_v60, 0.0 }
  0xe4   :  { %v140_v1 = vpack.c.bf16 %v138_v62, %v138_v62 }
  0xe5   :  { %v141_v0 = vpack.c.bf16 %v139_v63, %v139_v63 }
  0xe7   :  { %356 = vmatprep.mubr.bf16.mxu1 %v141_v0 }
  0xe8   :  { %357 = vmatmul.mubr.bf16.vlgmr.msra.gmra.mrb[4].mxu1 %v140_v1 }
 0x1bb   :  { %v546_v5 = vpop.f32.mrb[4].mxu1 }
 0x1bc   :  { %v547_v6 = vpop.f32.mrb[5].mxu1 }
 0x1bd   :  { %v548_v7 = vadd.f32 %v547_v6, %v546_v5  ;;  %v549_v8 = vpop.f32.mrb[6].mxu1 }
 0x1be   :  { %v550_v10 = vpop.f32.mrb[7].mxu1 }
 0x1bf   :  { %v359_v11 = vadd.f32 %v548_v7, %v222_v53 }
 0x1c1   :  { %v369_v13 = vadd.f32 %v518_v9, %v359_v11 }
 0x1c3   :  { %v370_v14 = vmax.f32 %v369_v13, 0.0 }
 0x1c5   :  { %v371_v15 = vpack.c.bf16 %v370_v14, %v370_v14 }
 0x1c7   :  { %584 = vmatmul.mubr.bf16.vlgmr.msra.gmra.mrb[4].mxu0 %v371_v15 }
 0x29a   :  { %v475_v16 = vpop.f32.mrb[4].mxu0 }
 0x29b   :  { %v476_v17 = vadd.f32 %v519_v12, %v475_v16  ;;  %v585_v18 = vpop.f32.mrb[5].mxu0 }
 0x29c   :  { %v478_v19 = vpop.f32.mrb[6].mxu0 }
 0x29d   :  { %481 = vmax.xlane.f32.xlu0 %v476_v17  ;;  %v586_v20 = vpop.f32.mrb[7].mxu0 }
 0x32a   :  { %v482_v21 = vpop.xlane.xlu0 %481 }
 0x32b   :  { %v483_v22 = vsub.f32 %v476_v17, %v482_v21 }
 0x32d   :  { %v484_v23 = vmul.f32 1.442695, %v483_v22 }
 0x32f   :  { %621 = vpow2.f32 %v484_v23 }
 0x339   :  { %v622_v24 = vpop.eup %621 }
 0x33a   :  { %486 = vadd.xlane.f32.xlu0 %v622_v24 }
 0x3c7   :  { %v487_v25 = vpop.xlane.xlu0 %486 }
 0x3c8   :  { %623 = vrcp.f32 %v487_v25 }
 0x3d2   :  { %v624_v26 = vpop.eup %623 }
 0x3d3   :  { %v489_v27 = vmul.f32 %v624_v26, %v622_v24 }
 0x3d5   :  { %490 = vst [vmem:[%s801_s8] sm:$0xff] %v489_v27 }

</bundles_post_ra>
